<compile_context>
chip_gen: v7x
topology: tpu7x:2x2x1
jax: 0.10.0
libtpu: 0.0.40
codegen_flags: <defaults>
</compile_context>

<pallas_src>
import jax
import jax.numpy as jnp
from jax.experimental import pallas as pl
from jax.experimental.pallas import tpu as pltpu

_LANE = 128
_SUBLANE = 8
_NEG_FILL = -1e30     # bias fill for padded logit columns (exp underflows to 0)
_MAX_TC = 16          # cap on in-kernel unrolled timesteps (code size / vregs)


def _round_up(n, m):
    return ((n + m - 1) // m) * m


def _cdiv(a, b):
    return -(-a // b)


# ---------------------------------------------------------------------------
# Kernel
# ---------------------------------------------------------------------------
def _ceca_seq_kernel(s0_ref, xs_ref, w_hh_ref, w_xh_ref, b_sx_ref,
                     w_hy_ref, b_hy_ref, ys_ref, ns_ref, state_scr):
    """One (batch_tile, time_chunk) grid cell.

    xs_ref/ys_ref/ns_ref blocks are (TC, bt, *); state_scr is a persistent
    [bt, hp] f32 VMEM scratch carrying the hidden state across time chunks.

    NOTE (correctness): the state carry requires the time axis to be the
    innermost grid dimension, marked "arbitrary" (sequential per core).  The
    batch axis may be "parallel": each core re-initializes the scratch at its
    own t_chunk==0 for every batch tile it owns.
    """
    t_chunk = pl.program_id(1)
    n_steps = xs_ref.shape[0]                # static time-chunk length (TC)
    bt, hp = state_scr.shape
    yp = b_hy_ref.shape[-1]
    cdt = w_hh_ref.dtype                     # MXU operand dtype (f32 or bf16)

    @pl.when(t_chunk == 0)
    def _():
        state_scr[...] = s0_ref[...].astype(jnp.float32)

    # Hoist the bias broadcasts out of the unrolled time loop (JAX does not
    # CSE broadcast_in_dim; one vreg each, re-used by every step).
    b_sx = jnp.broadcast_to(b_sx_ref[...], (bt, hp)).astype(jnp.float32)
    b_hy = jnp.broadcast_to(b_hy_ref[...], (bt, yp)).astype(jnp.float32)

    state = state_scr[...]
    # Fully-unrolled short time loop (TC <= _MAX_TC): static indices -> plain
    # vld/vst, and the scheduler interleaves MXU / EUP work across steps.
    for i in range(n_steps):
        x_t = xs_ref[i].astype(cdt)
        pre = (jnp.dot(state.astype(cdt), w_hh_ref[...],
                       preferred_element_type=jnp.float32)
               + jnp.dot(x_t, w_xh_ref[...],
                         preferred_element_type=jnp.float32)
               + b_sx)
        inner = jnp.tanh(pre)                     # f_hh = tanh
        new_state = jnp.tanh(state + inner)       # f_s  = tanh (CECA residual)

        logits = jnp.dot(new_state.astype(cdt), w_hy_ref[...],
                         preferred_element_type=jnp.float32) + b_hy
        m = jnp.max(logits, axis=-1, keepdims=True)
        z = logits - m
        lse = jnp.log(jnp.sum(jnp.exp(z), axis=-1, keepdims=True))

        ys_ref[i] = (z - lse).astype(ys_ref.dtype)   # f_hy = log_softmax
        ns_ref[i] = new_state.astype(ns_ref.dtype)
        state = new_state

    state_scr[...] = state                   # carry into the next time chunk


# ---------------------------------------------------------------------------
# One-time parameter packing (no per-call transposes)
# ---------------------------------------------------------------------------
def prepare_params(params, dtype=jnp.float32):
    """Pack PyTorch-layout params into padded, MXU-friendly [in, out] slabs.

    dtype=jnp.bfloat16 enables the bf16 MXU path on v6e/v7x (activations are
    cast to the weight dtype inside the kernel; accumulation stays f32).
    """
    W_hh, W_xh, W_hy = params["W_hh"], params["W_xh"], params["W_hy"]
    h_size, x_size = W_xh.shape              # nn.Linear weight is [out, in]
    y_size = W_hy.shape[0]

    hp = _round_up(h_size, _LANE)
    xp = _round_up(x_size, _LANE)
    yp = _round_up(y_size, _LANE)

    # Zero padding keeps padded state/input lanes identically 0 through tanh.
    w_hh = jnp.zeros((hp, hp), dtype).at[:h_size, :h_size].set(W_hh.T.astype(dtype))
    w_xh = jnp.zeros((xp, hp), dtype).at[:x_size, :h_size].set(W_xh.T.astype(dtype))
    b_sx = jnp.zeros((1, hp), dtype).at[0, :h_size].set(
        (params["b_hh"] + params["b_xh"]).astype(dtype))
    w_hy = jnp.zeros((hp, yp), dtype).at[:h_size, :y_size].set(W_hy.T.astype(dtype))
    # Padded logit columns: huge negative bias -> exp() == 0, so the
    # log-softmax over the real y_size columns is untouched.
    b_hy = jnp.full((1, yp), _NEG_FILL, dtype).at[0, :y_size].set(
        params["b_hy"].astype(dtype))

    return {"w_hh": w_hh, "w_xh": w_xh, "b_sx": b_sx, "w_hy": w_hy, "b_hy": b_hy,
            "x_size": x_size, "h_size": h_size, "y_size": y_size,
            "xp": xp, "hp": hp, "yp": yp}


# ---------------------------------------------------------------------------
# Sizing helpers
# ---------------------------------------------------------------------------
def _vmem_budget_bytes():
    """Per-generation usable VMEM (~96 MiB on v5e/v6e, ~48 MiB on v7x)."""
    cap = 64 << 20  # conservative fallback (v7x per-TC capacity)
    try:
        cap = int(pltpu.get_tpu_info().vmem_capacity_bytes)
    except Exception:
        pass
    return (cap * 3) // 4


def _batch_tiling(B):
    """Pick (bt, nb) with bt a multiple of 8, minimizing padding while giving
    v7x's second TensorCore work whenever the padded batch allows (nb >= 2)."""
    Bp8 = _round_up(max(B, 1), _SUBLANE)
    nb = max(1, _cdiv(Bp8, _LANE))
    if nb == 1 and Bp8 >= 2 * _SUBLANE:
        nb = 2
    bt = _round_up(_cdiv(Bp8, nb), _SUBLANE)
    return bt, nb


# ---------------------------------------------------------------------------
# Wrappers
# ---------------------------------------------------------------------------
def ceca_sequence_forward(xs, state0, prep, out_dtype=None):
    """xs: [T, B, x_size], state0: [B, h_size]
    -> (log_probs [T, B, y_size], states [T, B, h_size])."""
    T, B, x_in = xs.shape
    x_size, h_size, y_size = prep["x_size"], prep["h_size"], prep["y_size"]
    xp, hp, yp = prep["xp"], prep["hp"], prep["yp"]
    assert x_in == x_size and state0.shape == (B, h_size)
    out_dtype = out_dtype or xs.dtype        # bf16 halves per-step writeback

    bt, nb = _batch_tiling(B)
    Bp = bt * nb

    # ---- VMEM budget & time-chunk sizing (generation aware) ---------------
    single_buffer_ok = hasattr(pl, "Buffered")
    w_isz = jnp.dtype(prep["w_hh"].dtype).itemsize
    in_isz = jnp.dtype(xs.dtype).itemsize
    out_isz = jnp.dtype(out_dtype).itemsize
    s0_isz = jnp.dtype(state0.dtype).itemsize

    weight_bytes = w_isz * int(prep["w_hh"].size + prep["w_xh"].size +
                               prep["b_sx"].size + prep["w_hy"].size +
                               prep["b_hy"].size)
    weight_buf = 1 if single_buffer_ok else 2
    fixed_bytes = (weight_buf * weight_bytes            # resident weights
                   + 4 * bt * hp                        # carried-state scratch
                   + 2 * bt * hp * s0_isz)              # s0 block (dbl-buffered)
    per_step_bytes = bt * (xp * in_isz + (yp + hp) * out_isz)

    vmem_budget = _vmem_budget_bytes()
    avail = vmem_budget - fixed_bytes - (2 << 20)       # 2 MiB headroom
    if avail < 2 * per_step_bytes:
        # TODO(synk): for very large h_size/y_size, tile the weight output-
        # column dimension with an extra grid axis instead of full residency.
        raise ValueError("CECA weights too large for single-block VMEM residency")

    tc_cap = int(min(T, _MAX_TC, max(1, avail // (2 * per_step_bytes))))
    n_chunks = _cdiv(T, tc_cap)
    TC = _cdiv(T, n_chunks)                  # even chunks -> minimal T padding
    Tp = n_chunks * TC

    xs_p = jnp.zeros((Tp, Bp, xp), xs.dtype).at[:T, :B, :x_size].set(xs)
    s0_p = jnp.zeros((Bp, hp), state0.dtype).at[:B, :h_size].set(state0)

    flops = int(Tp * Bp * 2 * (hp * hp + xp * hp + hp * yp))
    transc = int(Tp * Bp * (2 * hp + yp + 1))
    bytes_acc = int(xs_p.size * in_isz + s0_p.size * s0_isz +
                    Tp * Bp * (yp + hp) * out_isz + weight_bytes)

    def _run(single_buffer_weights):
        wkw = ({"pipeline_mode": pl.Buffered(1)}        # constant blocks: 1 buf
               if single_buffer_weights else {})
        const2 = lambda b, t: (0, 0)
        grid_spec = pltpu.PrefetchScalarGridSpec(
            num_scalar_prefetch=0,
            grid=(nb, n_chunks),
            in_specs=[
                pl.BlockSpec((bt, hp), lambda b, t: (b, 0)),        # state0
                pl.BlockSpec((TC, bt, xp), lambda b, t: (t, b, 0)),  # x chunk
                pl.BlockSpec((hp, hp), const2, **wkw),  # W_hh^T (resident)
                pl.BlockSpec((xp, hp), const2, **wkw),  # W_xh^T (resident)
                pl.BlockSpec((1, hp), const2, **wkw),   # b_hh + b_xh
                pl.BlockSpec((hp, yp), const2, **wkw),  # W_hy^T (resident)
                pl.BlockSpec((1, yp), const2, **wkw),   # b_hy
            ],
            out_specs=(
                pl.BlockSpec((TC, bt, yp), lambda b, t: (t, b, 0)),  # log-probs
                pl.BlockSpec((TC, bt, hp), lambda b, t: (t, b, 0)),  # states
            ),
            scratch_shapes=[pltpu.VMEM((bt, hp), jnp.float32)],
        )
        return pl.pallas_call(
            _ceca_seq_kernel,
            out_shape=(
                jax.ShapeDtypeStruct((Tp, Bp, yp), out_dtype),
                jax.ShapeDtypeStruct((Tp, Bp, hp), out_dtype),
            ),
            grid_spec=grid_spec,
            compiler_params=pltpu.CompilerParams(
                # time axis MUST stay innermost + "arbitrary" (state carry).
                dimension_semantics=("parallel", "arbitrary"),
                vmem_limit_bytes=int(vmem_budget),
            ),
            cost_estimate=pl.CostEstimate(flops=flops, transcendentals=transc,
                                          bytes_accessed=bytes_acc),
        )(s0_p, xs_p, prep["w_hh"], prep["w_xh"], prep["b_sx"],
          prep["w_hy"], prep["b_hy"])

    try:
        ys_p, ns_p = _run(single_buffer_ok)
    except Exception:
        if not single_buffer_ok:
            raise
        ys_p, ns_p = _run(False)             # fallback: double-buffered weights

    return ys_p[:T, :B, :y_size], ns_p[:T, :B, :h_size]


def ceca_forward(x, state, prep):
    """Single-step CECA.forward: x [B, x_size], state [B, h_size]."""
    ys, ns = ceca_sequence_forward(x[None], state, prep)
    return ys[0], ns[0]


# ---------------------------------------------------------------------------
# Init + pure-JAX reference
# ---------------------------------------------------------------------------
def init_params(key, x_size, h_size, y_size, dtype=jnp.float32):
    """Deterministic synthetic params matching nn.Linear shapes (weight: [out, in])."""
    ks = jax.random.split(key, 6)

    def lin(kw, kb, out_f, in_f):
        bound = 1.0 / jnp.sqrt(in_f)
        w = jax.random.uniform(kw, (out_f, in_f), dtype, -bound, bound)
        b = jax.random.uniform(kb, (out_f,), dtype, -bound, bound)
        return w, b

    W_hh, b_hh = lin(ks[0], ks[1], h_size, h_size)
    W_xh, b_xh = lin(ks[2], ks[3], h_size, x_size)
    W_hy, b_hy = lin(ks[4], ks[5], y_size, h_size)
    return {"W_hh": W_hh, "b_hh": b_hh,
            "W_xh": W_xh, "b_xh": b_xh,
            "W_hy": W_hy, "b_hy": b_hy}


def ceca_reference_step(x, state, params):
    hh = state @ params["W_hh"].T + params["b_hh"]
    xh = x @ params["W_xh"].T + params["b_xh"]
    inner = jnp.tanh(hh + xh)
    new_state = jnp.tanh(state + inner)
    logits = new_state @ params["W_hy"].T + params["b_hy"]
    return jax.nn.log_softmax(logits, axis=-1), new_state


def ceca_reference_sequence(xs, state0, params):
    def step(s, x):
        y, ns = ceca_reference_step(x, s, params)
        return ns, (y, ns)
    _, (ys, nss) = jax.lax.scan(step, state0, xs)
    return ys, nss


if __name__ == "__main__":
    B, T, x_size, h_size, y_size = 2, 8, 16, 32, 8

    key = jax.random.PRNGKey(0)
    k_x, k_s, k_p = jax.random.split(key, 3)
    xs = jax.random.normal(k_x, (T, B, x_size), jnp.float32)
    state0 = jax.random.normal(k_s, (B, h_size), jnp.float32) * 0.1  # init_state(std=0.1)
    params = init_params(k_p, x_size, h_size, y_size)
    prep = prepare_params(params)  # packed once, reused every call

    # Single step — matches CECA.forward(x, state).
    y1, s1 = ceca_forward(xs[0], state0, prep)
    jax.block_until_ready((y1, s1))
    y1_ref, s1_ref = ceca_reference_step(xs[0], state0, params)
    assert jnp.allclose(y1, y1_ref, atol=1e-5, rtol=1e-5), "step log-prob mismatch"
    assert jnp.allclose(s1, s1_ref, atol=1e-5, rtol=1e-5), "step state mismatch"

    # Fused multi-step sequence — one pallas_call, time-chunked grid,
    # weights VMEM-resident.
    ys, nss = ceca_sequence_forward(xs, state0, prep)
    jax.block_until_ready((ys, nss))
    ys_ref, nss_ref = ceca_reference_sequence(xs, state0, params)
    assert jnp.allclose(ys, ys_ref, atol=1e-5, rtol=1e-5), "seq log-prob mismatch"
    assert jnp.allclose(nss, nss_ref, atol=1e-5, rtol=1e-5), "seq state mismatch"

    print("KERNEL_OK")
</pallas_src>

<mosaic_0001>
module attributes {stable_mosaic.version = 11 : i64} {
  func.func @_ceca_seq_kernel(%arg0: i32, %arg1: i32, %arg2: memref<8x128xf32, #tpu.memory_space<vmem>>, %arg3: memref<1x8x128xf32, #tpu.memory_space<vmem>>, %arg4: memref<128x128xf32, #tpu.memory_space<vmem>>, %arg5: memref<128x128xf32, #tpu.memory_space<vmem>>, %arg6: memref<1x128xf32, #tpu.memory_space<vmem>>, %arg7: memref<128x128xf32, #tpu.memory_space<vmem>>, %arg8: memref<1x128xf32, #tpu.memory_space<vmem>>, %arg9: memref<1x8x128xf32, #tpu.memory_space<vmem>>, %arg10: memref<1x8x128xf32, #tpu.memory_space<vmem>>, %arg11: memref<8x128xf32, #tpu.memory_space<vmem>>) attributes {dimension_semantics = [#tpu.dimension_semantics<parallel>, #tpu.dimension_semantics<arbitrary>], iteration_bounds = array<i64: 1, 1>, scalar_prefetch = 0 : i64, scratch_operands = 1 : i64, tpu.core_type = #tpu.core_type<tc>, window_params = [{transform_indices = @transform_0, window_bounds = array<i64: 8, 128>}, {transform_indices = @transform_1, window_bounds = array<i64: 1, 8, 128>}, {pipeline_mode = #tpu.pipeline_mode<synchronous>, transform_indices = @transform_2, window_bounds = array<i64: 128, 128>}, {pipeline_mode = #tpu.pipeline_mode<synchronous>, transform_indices = @transform_3, window_bounds = array<i64: 128, 128>}, {pipeline_mode = #tpu.pipeline_mode<synchronous>, transform_indices = @transform_4, window_bounds = array<i64: 1, 128>}, {pipeline_mode = #tpu.pipeline_mode<synchronous>, transform_indices = @transform_5, window_bounds = array<i64: 128, 128>}, {pipeline_mode = #tpu.pipeline_mode<synchronous>, transform_indices = @transform_6, window_bounds = array<i64: 1, 128>}, {transform_indices = @transform_7, window_bounds = array<i64: 1, 8, 128>}, {transform_indices = @transform_8, window_bounds = array<i64: 1, 8, 128>}]} {
    %c0_i32 = arith.constant 0 : i32
    %0 = arith.cmpi eq, %arg1, %c0_i32 : i32
    %1 = arith.extui %0 : i1 to i32
    %c0_i32_0 = arith.constant 0 : i32
    %2 = arith.cmpi ne, %1, %c0_i32_0 : i32
    scf.if %2 {
      %c0_27 = arith.constant 0 : index
      %c0_28 = arith.constant 0 : index
      %41 = vector.load %arg2[%c0_27, %c0_28] : memref<8x128xf32, #tpu.memory_space<vmem>>, vector<8x128xf32>
      %c0_29 = arith.constant 0 : index
      %c0_30 = arith.constant 0 : index
      %42 = vector.load %arg11[%c0_29, %c0_30] : memref<8x128xf32, #tpu.memory_space<vmem>>, vector<8x128xf32>
      tpu.vector_store %arg11[%c0_29, %c0_30], %41 {strides = array<i32>} : memref<8x128xf32, #tpu.memory_space<vmem>>, vector<8x128xf32>,
    } else {
    }
    %c0 = arith.constant 0 : index
    %c0_1 = arith.constant 0 : index
    %3 = vector.load %arg6[%c0, %c0_1] : memref<1x128xf32, #tpu.memory_space<vmem>>, vector<1x128xf32>
    %4 = vector.shape_cast %3 : vector<1x128xf32> to vector<1x128xf32>
    %5 = vector.broadcast %4 : vector<1x128xf32> to vector<8x128xf32>
    %c0_2 = arith.constant 0 : index
    %c0_3 = arith.constant 0 : index
    %6 = vector.load %arg8[%c0_2, %c0_3] : memref<1x128xf32, #tpu.memory_space<vmem>>, vector<1x128xf32>
    %7 = vector.shape_cast %6 : vector<1x128xf32> to vector<1x128xf32>
    %8 = vector.broadcast %7 : vector<1x128xf32> to vector<8x128xf32>
    %c0_4 = arith.constant 0 : index
    %c0_5 = arith.constant 0 : index
    %9 = vector.load %arg11[%c0_4, %c0_5] : memref<8x128xf32, #tpu.memory_space<vmem>>, vector<8x128xf32>
    %c0_6 = arith.constant 0 : index
    %c0_7 = arith.constant 0 : index
    %c0_8 = arith.constant 0 : index
    %10 = vector.load %arg3[%c0_6, %c0_7, %c0_8] : memref<1x8x128xf32, #tpu.memory_space<vmem>>, vector<1x8x128xf32>
    %11 = vector.shape_cast %10 : vector<1x8x128xf32> to vector<8x128xf32>
    %c0_9 = arith.constant 0 : index
    %c0_10 = arith.constant 0 : index
    %12 = vector.load %arg4[%c0_9, %c0_10] : memref<128x128xf32, #tpu.memory_space<vmem>>, vector<128x128xf32>
    %cst = arith.constant dense<0.000000e+00> : vector<8x128xf32>
    %13 = tpu.matmul %9, %12, %cst {dimension_numbers = #tpu.dot_dimension_numbers<[1], [0], [0], [1], [0, 0, 1, 1], [], []>} : vector<8x128xf32>, vector<128x128xf32>, vector<8x128xf32> -> vector<8x128xf32>
    %c0_11 = arith.constant 0 : index
    %c0_12 = arith.constant 0 : index
    %14 = vector.load %arg5[%c0_11, %c0_12] : memref<128x128xf32, #tpu.memory_space<vmem>>, vector<128x128xf32>
    %cst_13 = arith.constant dense<0.000000e+00> : vector<8x128xf32>
    %15 = tpu.matmul %11, %14, %cst_13 {dimension_numbers = #tpu.dot_dimension_numbers<[1], [0], [0], [1], [0, 0, 1, 1], [], []>} : vector<8x128xf32>, vector<128x128xf32>, vector<8x128xf32> -> vector<8x128xf32>
    %16 = arith.addf %13, %15 : vector<8x128xf32>
    %17 = arith.addf %16, %5 : vector<8x128xf32>
    %18 = math.tanh %17 : vector<8x128xf32>
    %19 = arith.addf %9, %18 : vector<8x128xf32>
    %20 = math.tanh %19 : vector<8x128xf32>
    %c0_14 = arith.constant 0 : index
    %c0_15 = arith.constant 0 : index
    %21 = vector.load %arg7[%c0_14, %c0_15] : memref<128x128xf32, #tpu.memory_space<vmem>>, vector<128x128xf32>
    %cst_16 = arith.constant dense<0.000000e+00> : vector<8x128xf32>
    %22 = tpu.matmul %20, %21, %cst_16 {dimension_numbers = #tpu.dot_dimension_numbers<[1], [0], [0], [1], [0, 0, 1, 1], [], []>} : vector<8x128xf32>, vector<128x128xf32>, vector<8x128xf32> -> vector<8x128xf32>
    %23 = arith.addf %22, %8 : vector<8x128xf32>
    %cst_17 = arith.constant dense<0xFF800000> : vector<8xf32>
    %24 = vector.multi_reduction <maximumf>, %23, %cst_17 [1] : vector<8x128xf32> to vector<8xf32>
    %25 = vector.shape_cast %24 : vector<8xf32> to vector<8x1xf32>
    %26 = vector.broadcast %25 : vector<8x1xf32> to vector<8x128xf32>
    %27 = arith.subf %23, %26 : vector<8x128xf32>
    %28 = math.exp %27 : vector<8x128xf32>
    %cst_18 = arith.constant dense<0.000000e+00> : vector<8xf32>
    %29 = vector.multi_reduction <add>, %28, %cst_18 [1] : vector<8x128xf32> to vector<8xf32>
    %30 = vector.shape_cast %29 : vector<8xf32> to vector<8x1xf32>
    %31 = math.log %30 : vector<8x1xf32>
    %32 = vector.broadcast %31 : vector<8x1xf32> to vector<8x128xf32>
    %33 = arith.subf %27, %32 : vector<8x128xf32>
    %c0_19 = arith.constant 0 : index
    %c0_20 = arith.constant 0 : index
    %c0_21 = arith.constant 0 : index
    %34 = vector.load %arg9[%c0_19, %c0_20, %c0_21] : memref<1x8x128xf32, #tpu.memory_space<vmem>>, vector<1x8x128xf32>
    %35 = vector.shape_cast %34 : vector<1x8x128xf32> to vector<8x128xf32>
    %36 = vector.shape_cast %33 : vector<8x128xf32> to vector<1x8x128xf32>
    tpu.vector_store %arg9[%c0_19, %c0_20, %c0_21], %36 {strides = array<i32>} : memref<1x8x128xf32, #tpu.memory_space<vmem>>, vector<1x8x128xf32>,
    %c0_22 = arith.constant 0 : index
    %c0_23 = arith.constant 0 : index
    %c0_24 = arith.constant 0 : index
    %37 = vector.load %arg10[%c0_22, %c0_23, %c0_24] : memref<1x8x128xf32, #tpu.memory_space<vmem>>, vector<1x8x128xf32>
    %38 = vector.shape_cast %37 : vector<1x8x128xf32> to vector<8x128xf32>
    %39 = vector.shape_cast %20 : vector<8x128xf32> to vector<1x8x128xf32>
    tpu.vector_store %arg10[%c0_22, %c0_23, %c0_24], %39 {strides = array<i32>} : memref<1x8x128xf32, #tpu.memory_space<vmem>>, vector<1x8x128xf32>,
    %c0_25 = arith.constant 0 : index
    %c0_26 = arith.constant 0 : index
    %40 = vector.load %arg11[%c0_25, %c0_26] : memref<8x128xf32, #tpu.memory_space<vmem>>, vector<8x128xf32>
    tpu.vector_store %arg11[%c0_25, %c0_26], %20 {strides = array<i32>} : memref<8x128xf32, #tpu.memory_space<vmem>>, vector<8x128xf32>,
    return
  }
  func.func @transform_0(%arg0: i32, %arg1: i32) -> (i32, i32) {
    %c0_i32 = arith.constant 0 : i32
    %c0_i32_0 = arith.constant 0 : i32
    return %arg0, %c0_i32 : i32, i32
  }
  func.func @transform_1(%arg0: i32, %arg1: i32) -> (i32, i32, i32) {
    %c0_i32 = arith.constant 0 : i32
    %c0_i32_0 = arith.constant 0 : i32
    return %arg1, %arg0, %c0_i32 : i32, i32, i32
  }
  func.func @transform_2(%arg0: i32, %arg1: i32) -> (i32, i32) {
    %c0_i32 = arith.constant 0 : i32
    %c0_i32_0 = arith.constant 0 : i32
    %c0_i32_1 = arith.constant 0 : i32
    return %c0_i32, %c0_i32_0 : i32, i32
  }
  func.func @transform_3(%arg0: i32, %arg1: i32) -> (i32, i32) {
    %c0_i32 = arith.constant 0 : i32
    %c0_i32_0 = arith.constant 0 : i32
    %c0_i32_1 = arith.constant 0 : i32
    return %c0_i32, %c0_i32_0 : i32, i32
  }
  func.func @transform_4(%arg0: i32, %arg1: i32) -> (i32, i32) {
    %c0_i32 = arith.constant 0 : i32
    %c0_i32_0 = arith.constant 0 : i32
    %c0_i32_1 = arith.constant 0 : i32
    return %c0_i32, %c0_i32_0 : i32, i32
  }
  func.func @transform_5(%arg0: i32, %arg1: i32) -> (i32, i32) {
    %c0_i32 = arith.constant 0 : i32
    %c0_i32_0 = arith.constant 0 : i32
    %c0_i32_1 = arith.constant 0 : i32
    return %c0_i32, %c0_i32_0 : i32, i32
  }
  func.func @transform_6(%arg0: i32, %arg1: i32) -> (i32, i32) {
    %c0_i32 = arith.constant 0 : i32
    %c0_i32_0 = arith.constant 0 : i32
    %c0_i32_1 = arith.constant 0 : i32
    return %c0_i32, %c0_i32_0 : i32, i32
  }
  func.func @transform_7(%arg0: i32, %arg1: i32) -> (i32, i32, i32) {
    %c0_i32 = arith.constant 0 : i32
    %c0_i32_0 = arith.constant 0 : i32
    return %arg1, %arg0, %c0_i32 : i32, i32, i32
  }
  func.func @transform_8(%arg0: i32, %arg1: i32) -> (i32, i32, i32) {
    %c0_i32 = arith.constant 0 : i32
    %c0_i32_0 = arith.constant 0 : i32
    return %arg1, %arg0, %c0_i32 : i32, i32, i32
  }
}

module attributes {stable_mosaic.version = 11 : i64} {
  func.func @_ceca_seq_kernel(%arg0: i32, %arg1: i32, %arg2: memref<8x128xf32, #tpu.memory_space<vmem>>, %arg3: memref<1x8x128xf32, #tpu.memory_space<vmem>>, %arg4: memref<128x128xf32, #tpu.memory_space<vmem>>, %arg5: memref<128x128xf32, #tpu.memory_space<vmem>>, %arg6: memref<1x128xf32, #tpu.memory_space<vmem>>, %arg7: memref<128x128xf32, #tpu.memory_space<vmem>>, %arg8: memref<1x128xf32, #tpu.memory_space<vmem>>, %arg9: memref<1x8x128xf32, #tpu.memory_space<vmem>>, %arg10: memref<1x8x128xf32, #tpu.memory_space<vmem>>, %arg11: memref<8x128xf32, #tpu.memory_space<vmem>>) attributes {dimension_semantics = [#tpu.dimension_semantics<parallel>, #tpu.dimension_semantics<arbitrary>], iteration_bounds = array<i64: 1, 1>, scalar_prefetch = 0 : i64, scratch_operands = 1 : i64, tpu.core_type = #tpu.core_type<tc>, window_params = [{transform_indices = @transform_0, window_bounds = array<i64: 8, 128>}, {transform_indices = @transform_1, window_bounds = array<i64: 1, 8, 128>}, {pipeline_mode = #tpu.pipeline_mode<synchronous>, transform_indices = @transform_2, window_bounds = array<i64: 128, 128>}, {pipeline_mode = #tpu.pipeline_mode<synchronous>, transform_indices = @transform_3, window_bounds = array<i64: 128, 128>}, {pipeline_mode = #tpu.pipeline_mode<synchronous>, transform_indices = @transform_4, window_bounds = array<i64: 1, 128>}, {pipeline_mode = #tpu.pipeline_mode<synchronous>, transform_indices = @transform_5, window_bounds = array<i64: 128, 128>}, {pipeline_mode = #tpu.pipeline_mode<synchronous>, transform_indices = @transform_6, window_bounds = array<i64: 1, 128>}, {transform_indices = @transform_7, window_bounds = array<i64: 1, 8, 128>}, {transform_indices = @transform_8, window_bounds = array<i64: 1, 8, 128>}]} {
    %c0_i32 = arith.constant 0 : i32
    %0 = arith.cmpi eq, %arg1, %c0_i32 : i32
    %1 = arith.extui %0 : i1 to i32
    %c0_i32_0 = arith.constant 0 : i32
    %2 = arith.cmpi ne, %1, %c0_i32_0 : i32
    scf.if %2 {
      %c0_27 = arith.constant 0 : index
      %c0_28 = arith.constant 0 : index
      %41 = vector.load %arg2[%c0_27, %c0_28] : memref<8x128xf32, #tpu.memory_space<vmem>>, vector<8x128xf32>
      %c0_29 = arith.constant 0 : index
      %c0_30 = arith.constant 0 : index
      %42 = vector.load %arg11[%c0_29, %c0_30] : memref<8x128xf32, #tpu.memory_space<vmem>>, vector<8x128xf32>
      tpu.vector_store %arg11[%c0_29, %c0_30], %41 {strides = array<i32>} : memref<8x128xf32, #tpu.memory_space<vmem>>, vector<8x128xf32>,
    } else {
    }
    %c0 = arith.constant 0 : index
    %c0_1 = arith.constant 0 : index
    %3 = vector.load %arg6[%c0, %c0_1] : memref<1x128xf32, #tpu.memory_space<vmem>>, vector<1x128xf32>
    %4 = vector.shape_cast %3 : vector<1x128xf32> to vector<1x128xf32>
    %5 = vector.broadcast %4 : vector<1x128xf32> to vector<8x128xf32>
    %c0_2 = arith.constant 0 : index
    %c0_3 = arith.constant 0 : index
    %6 = vector.load %arg8[%c0_2, %c0_3] : memref<1x128xf32, #tpu.memory_space<vmem>>, vector<1x128xf32>
    %7 = vector.shape_cast %6 : vector<1x128xf32> to vector<1x128xf32>
    %8 = vector.broadcast %7 : vector<1x128xf32> to vector<8x128xf32>
    %c0_4 = arith.constant 0 : index
    %c0_5 = arith.constant 0 : index
    %9 = vector.load %arg11[%c0_4, %c0_5] : memref<8x128xf32, #tpu.memory_space<vmem>>, vector<8x128xf32>
    %c0_6 = arith.constant 0 : index
    %c0_7 = arith.constant 0 : index
    %c0_8 = arith.constant 0 : index
    %10 = vector.load %arg3[%c0_6, %c0_7, %c0_8] : memref<1x8x128xf32, #tpu.memory_space<vmem>>, vector<1x8x128xf32>
    %11 = vector.shape_cast %10 : vector<1x8x128xf32> to vector<8x128xf32>
    %c0_9 = arith.constant 0 : index
    %c0_10 = arith.constant 0 : index
    %12 = vector.load %arg4[%c0_9, %c0_10] : memref<128x128xf32, #tpu.memory_space<vmem>>, vector<128x128xf32>
    %cst = arith.constant dense<0.000000e+00> : vector<8x128xf32>
    %13 = tpu.matmul %9, %12, %cst {dimension_numbers = #tpu.dot_dimension_numbers<[1], [0], [0], [1], [0, 0, 1, 1], [], []>} : vector<8x128xf32>, vector<128x128xf32>, vector<8x128xf32> -> vector<8x128xf32>
    %c0_11 = arith.constant 0 : index
    %c0_12 = arith.constant 0 : index
    %14 = vector.load %arg5[%c0_11, %c0_12] : memref<128x128xf32, #tpu.memory_space<vmem>>, vector<128x128xf32>
    %cst_13 = arith.constant dense<0.000000e+00> : vector<8x128xf32>
    %15 = tpu.matmul %11, %14, %cst_13 {dimension_numbers = #tpu.dot_dimension_numbers<[1], [0], [0], [1], [0, 0, 1, 1], [], []>} : vector<8x128xf32>, vector<128x128xf32>, vector<8x128xf32> -> vector<8x128xf32>
    %16 = arith.addf %13, %15 : vector<8x128xf32>
    %17 = arith.addf %16, %5 : vector<8x128xf32>
    %18 = math.tanh %17 : vector<8x128xf32>
    %19 = arith.addf %9, %18 : vector<8x128xf32>
    %20 = math.tanh %19 : vector<8x128xf32>
    %c0_14 = arith.constant 0 : index
    %c0_15 = arith.constant 0 : index
    %21 = vector.load %arg7[%c0_14, %c0_15] : memref<128x128xf32, #tpu.memory_space<vmem>>, vector<128x128xf32>
    %cst_16 = arith.constant dense<0.000000e+00> : vector<8x128xf32>
    %22 = tpu.matmul %20, %21, %cst_16 {dimension_numbers = #tpu.dot_dimension_numbers<[1], [0], [0], [1], [0, 0, 1, 1], [], []>} : vector<8x128xf32>, vector<128x128xf32>, vector<8x128xf32> -> vector<8x128xf32>
    %23 = arith.addf %22, %8 : vector<8x128xf32>
    %cst_17 = arith.constant dense<0xFF800000> : vector<8xf32>
    %24 = vector.multi_reduction <maximumf>, %23, %cst_17 [1] : vector<8x128xf32> to vector<8xf32>
    %25 = vector.shape_cast %24 : vector<8xf32> to vector<8x1xf32>
    %26 = vector.broadcast %25 : vector<8x1xf32> to vector<8x128xf32>
    %27 = arith.subf %23, %26 : vector<8x128xf32>
    %28 = math.exp %27 : vector<8x128xf32>
    %cst_18 = arith.constant dense<0.000000e+00> : vector<8xf32>
    %29 = vector.multi_reduction <add>, %28, %cst_18 [1] : vector<8x128xf32> to vector<8xf32>
    %30 = vector.shape_cast %29 : vector<8xf32> to vector<8x1xf32>
    %31 = math.log %30 : vector<8x1xf32>
    %32 = vector.broadcast %31 : vector<8x1xf32> to vector<8x128xf32>
    %33 = arith.subf %27, %32 : vector<8x128xf32>
    %c0_19 = arith.constant 0 : index
    %c0_20 = arith.constant 0 : index
    %c0_21 = arith.constant 0 : index
    %34 = vector.load %arg9[%c0_19, %c0_20, %c0_21] : memref<1x8x128xf32, #tpu.memory_space<vmem>>, vector<1x8x128xf32>
    %35 = vector.shape_cast %34 : vector<1x8x128xf32> to vector<8x128xf32>
    %36 = vector.shape_cast %33 : vector<8x128xf32> to vector<1x8x128xf32>
    tpu.vector_store %arg9[%c0_19, %c0_20, %c0_21], %36 {strides = array<i32>} : memref<1x8x128xf32, #tpu.memory_space<vmem>>, vector<1x8x128xf32>,
    %c0_22 = arith.constant 0 : index
    %c0_23 = arith.constant 0 : index
    %c0_24 = arith.constant 0 : index
    %37 = vector.load %arg10[%c0_22, %c0_23, %c0_24] : memref<1x8x128xf32, #tpu.memory_space<vmem>>, vector<1x8x128xf32>
    %38 = vector.shape_cast %37 : vector<1x8x128xf32> to vector<8x128xf32>
    %39 = vector.shape_cast %20 : vector<8x128xf32> to vector<1x8x128xf32>
    tpu.vector_store %arg10[%c0_22, %c0_23, %c0_24], %39 {strides = array<i32>} : memref<1x8x128xf32, #tpu.memory_space<vmem>>, vector<1x8x128xf32>,
    %c0_25 = arith.constant 0 : index
    %c0_26 = arith.constant 0 : index
    %40 = vector.load %arg11[%c0_25, %c0_26] : memref<8x128xf32, #tpu.memory_space<vmem>>, vector<8x128xf32>
    tpu.vector_store %arg11[%c0_25, %c0_26], %20 {strides = array<i32>} : memref<8x128xf32, #tpu.memory_space<vmem>>, vector<8x128xf32>,
    return
  }
  func.func @transform_0(%arg0: i32, %arg1: i32) -> (i32, i32) {
    %c0_i32 = arith.constant 0 : i32
    %c0_i32_0 = arith.constant 0 : i32
    return %arg0, %c0_i32 : i32, i32
  }
  func.func @transform_1(%arg0: i32, %arg1: i32) -> (i32, i32, i32) {
    %c0_i32 = arith.constant 0 : i32
    %c0_i32_0 = arith.constant 0 : i32
    return %arg1, %arg0, %c0_i32 : i32, i32, i32
  }
  func.func @transform_2(%arg0: i32, %arg1: i32) -> (i32, i32) {
    %c0_i32 = arith.constant 0 : i32
    %c0_i32_0 = arith.constant 0 : i32
    %c0_i32_1 = arith.constant 0 : i32
    return %c0_i32, %c0_i32_0 : i32, i32
  }
  func.func @transform_3(%arg0: i32, %arg1: i32) -> (i32, i32) {
    %c0_i32 = arith.constant 0 : i32
    %c0_i32_0 = arith.constant 0 : i32
    %c0_i32_1 = arith.constant 0 : i32
    return %c0_i32, %c0_i32_0 : i32, i32
  }
  func.func @transform_4(%arg0: i32, %arg1: i32) -> (i32, i32) {
    %c0_i32 = arith.constant 0 : i32
    %c0_i32_0 = arith.constant 0 : i32
    %c0_i32_1 = arith.constant 0 : i32
    return %c0_i32, %c0_i32_0 : i32, i32
  }
  func.func @transform_5(%arg0: i32, %arg1: i32) -> (i32, i32) {
    %c0_i32 = arith.constant 0 : i32
    %c0_i32_0 = arith.constant 0 : i32
    %c0_i32_1 = arith.constant 0 : i32
    return %c0_i32, %c0_i32_0 : i32, i32
  }
  func.func @transform_6(%arg0: i32, %arg1: i32) -> (i32, i32) {
    %c0_i32 = arith.constant 0 : i32
    %c0_i32_0 = arith.constant 0 : i32
    %c0_i32_1 = arith.constant 0 : i32
    return %c0_i32, %c0_i32_0 : i32, i32
  }
  func.func @transform_7(%arg0: i32, %arg1: i32) -> (i32, i32, i32) {
    %c0_i32 = arith.constant 0 : i32
    %c0_i32_0 = arith.constant 0 : i32
    return %arg1, %arg0, %c0_i32 : i32, i32, i32
  }
  func.func @transform_8(%arg0: i32, %arg1: i32) -> (i32, i32, i32) {
    %c0_i32 = arith.constant 0 : i32
    %c0_i32_0 = arith.constant 0 : i32
    return %arg1, %arg0, %c0_i32 : i32, i32, i32
  }
}

</mosaic_0001>

<bundles_post_ra>
// kernel: tpu_custom_call.1
= control target key start
LH: loop header
LB: loop body
LE: loop exit
PB: predicated region body
PF: predicated region fallthrough
CT: control target
= control target key end

     0   :  { %14 = vsyncpa [#allocation4], 0  ;;  %s1022_s0 = inlined_call_operand.hbm [shape: f32[8,128], index: 0, kind: input, shape index: {}]   ;;  %s1023_s1 = inlined_call_operand.hbm [shape: f32[1,8,128], index: 1, kind: input, shape index: {}]   ;;  %s1024_s2 = inlined_call_operand.hbm [shape: f32[128,128], index: 2, kind: input, shape index: {}]   ;;  %s1025_s3 = inlined_call_operand.hbm [shape: f32[128,128], index: 3, kind: input, shape index: {}]   ;;  %s1026_s4 = inlined_call_operand.vmem [shape: f32[1,128], index: 4, kind: input, shape index: {}]   ;;  %s1027_s5 = inlined_call_operand.hbm [shape: f32[128,128], index: 5, kind: input, shape index: {}]   ;;  %s1028_s6 = inlined_call_operand.vmem [shape: f32[1,128], index: 6, kind: input, shape index: {}]   ;;  %s1029_s7 = inlined_call_operand.hbm [shape: f32[1,8,128], index: 7, kind: output, shape index: {0}]   ;;  %s1030_s8 = inlined_call_operand.hbm [shape: f32[1,8,128], index: 8, kind: output, shape index: {1}]  }
   0x1   :  { %15 = vsyncpa [#allocation7], 0 }
   0x2   :  { %16 = vsyncpa [#allocation10], 0 }
   0x3   :  { %17 = vsyncpa [#allocation5], 0 }
   0x4   :  { %18 = vsyncpa [#allocation14], 0  ;;  %s836_s27 = smov [#allocation6]   ;;  %s672_s9 = scalar_lea.hbm %s1023_s1, 128 }
   0x5   :  { %s35_s28 = sshll.u32 %s836_s27, 4  ;;  %p673_p0 = scmp.ne.s32.totalorder %s1023_s1, %s672_s9  ;;  %s36_s28 = int_to_ptr.vmem [resolvable:$true] %s35_s28 }
   0x6   :  { %p676_p1 = scmp.lt.u32.totalorder %s672_s9, %s1023_s1 }
   0x8   :  { %p678_p2 = pnand %p676_p1, %p673_p0 }
   0xa   :  { %681 = shalt.err (!%p678_p2)
}
   0xb   :  { %s682_s14 = scalar_lea.vmem %s36_s28, 128  ;;  %p687_p4 = scmp.lt.s32.totalorder %s36_s28, %s36_s28 }
   0xc   :  { %p683_p3 = scmp.ne.s32.totalorder %s36_s28, %s682_s14  ;;  %p688_p5 = scmp.lt.s32.totalorder %s682_s14, %s682_s14 }
   0xe   :  { %p689_p6 = por %p688_p5, %p687_p4 }
  0x10   :  { %p690_p7 = pnand %p689_p6, %p683_p3 }
  0x12   :  { %693 = shalt.err (!%p690_p7)
}
  0x13   :  { %38 = dma.hbm_to_vmem [thread:$0]  %s1023_s1, 128, %s36_s28, [#allocation7]  }
  0x14   :  { %s837_s17 = smov [#allocation9]   ;;  %s838_s19 = smov [#allocation3]  }
  0x15   :  { %s56_s18 = sshll.u32 %s837_s17, 4  ;;  %s25_s20 = sshll.u32 %s838_s19, 4  ;;  %s57_s18 = int_to_ptr.vmem [resolvable:$true] %s56_s18  ;;  %s26_s20 = int_to_ptr.vmem [resolvable:$true] %s25_s20 }
  0x16   :  { %s694_s23 = scalar_lea.hbm %s1025_s3, 2048 }
  0x17   :  { %p695_p8 = scmp.ne.s32.totalorder %s1025_s3, %s694_s23  ;;  %p698_p9 = scmp.lt.u32.totalorder %s694_s23, %s1025_s3 }
  0x19   :  { %p700_p10 = pnand %p698_p9, %p695_p8 }
  0x1b   :  { %703 = shalt.err (!%p700_p10)
}
  0x1c   :  { %s704_s1 = scalar_lea.vmem %s57_s18, 2048  ;;  %p709_p12 = scmp.lt.s32.totalorder %s57_s18, %s57_s18 }
  0x1d   :  { %p705_p11 = scmp.ne.s32.totalorder %s57_s18, %s704_s1  ;;  %p710_p13 = scmp.lt.s32.totalorder %s704_s1, %s704_s1 }
  0x1f   :  { %p711_p0 = por %p710_p13, %p709_p12 }
  0x21   :  { %p712_p1 = pnand %p711_p0, %p705_p11 }
  0x23   :  { %715 = shalt.err (!%p712_p1)
}
  0x24   :  { %s839_s28 = smov 128   ;;  %s840_s29 = smov 8  }
  0x25   :  { %62 = dma.hbm_to_vmem [thread:$0]  %s1025_s3, 2048, %s57_s18, [#allocation10], %s839_s28, %s839_s28, %s840_s29  }
  0x26   :  { %s716_s12 = scalar_lea.hbm %s1022_s0, 128 }
  0x27   :  { %p717_p2 = scmp.ne.s32.totalorder %s1022_s0, %s716_s12  ;;  %p720_p3 = scmp.lt.u32.totalorder %s716_s12, %s1022_s0 }
  0x29   :  { %p722_p4 = pnand %p720_p3, %p717_p2 }
  0x2b   :  { %725 = shalt.err (!%p722_p4)
}
  0x2c   :  { %s726_s17 = scalar_lea.vmem %s26_s20, 128  ;;  %p731_p6 = scmp.lt.s32.totalorder %s26_s20, %s26_s20 }
  0x2d   :  { %p727_p5 = scmp.ne.s32.totalorder %s26_s20, %s726_s17  ;;  %p732_p7 = scmp.lt.s32.totalorder %s726_s17, %s726_s17 }
  0x2f   :  { %p733_p8 = por %p732_p7, %p731_p6 }
  0x31   :  { %p734_p9 = pnand %p733_p8, %p727_p5 }
  0x33   :  { %737 = shalt.err (!%p734_p9)
}
  0x34   :  { %28 = dma.hbm_to_vmem [thread:$0]  %s1022_s0, 128, %s26_s20, [#allocation4]  }
  0x35   :  { %s841_s19 = smov [#allocation8]   ;;  %s842_s22 = smov [#allocation11]  }
  0x36   :  { %s44_s21 = sshll.u32 %s841_s19, 4  ;;  %s70_s23 = sshll.u32 %s842_s22, 4  ;;  %s45_s21 = int_to_ptr.vmem [resolvable:$true] %s44_s21  ;;  %s71_s23 = int_to_ptr.vmem [resolvable:$true] %s70_s23 }
  0x37   :  { %s738_s26 = scalar_lea.hbm %s1024_s2, 2048 }
  0x38   :  { %p739_p10 = scmp.ne.s32.totalorder %s1024_s2, %s738_s26  ;;  %p742_p11 = scmp.lt.u32.totalorder %s738_s26, %s1024_s2 }
  0x3a   :  { %p744_p12 = pnand %p742_p11, %p739_p10 }
  0x3c   :  { %747 = shalt.err (!%p744_p12)
}
  0x3d   :  { %s748_s0 = scalar_lea.vmem %s45_s21, 2048  ;;  %p753_p0 = scmp.lt.s32.totalorder %s45_s21, %s45_s21 }
  0x3e   :  { %p749_p13 = scmp.ne.s32.totalorder %s45_s21, %s748_s0  ;;  %p754_p1 = scmp.lt.s32.totalorder %s748_s0, %s748_s0 }
  0x40   :  { %p755_p2 = por %p754_p1, %p753_p0 }
  0x42   :  { %p756_p3 = pnand %p755_p2, %p749_p13 }
  0x44   :  { %759 = shalt.err (!%p756_p3)
}
  0x45   :  { %50 = dma.hbm_to_vmem [thread:$0]  %s1024_s2, 2048, %s45_s21, [#allocation7], %s839_s28, %s839_s28, %s840_s29  }
  0x46   :  { %s760_s13 = scalar_lea.hbm %s1027_s5, 2048 }
  0x47   :  { %p761_p4 = scmp.ne.s32.totalorder %s1027_s5, %s760_s13  ;;  %p764_p5 = scmp.lt.u32.totalorder %s760_s13, %s1027_s5 }
  0x49   :  { %p766_p6 = pnand %p764_p5, %p761_p4 }
  0x4b   :  { %769 = shalt.err (!%p766_p6)
}
  0x4c   :  { %s770_s3 = scalar_lea.vmem %s71_s23, 2048  ;;  %p775_p8 = scmp.lt.s32.totalorder %s71_s23, %s71_s23 }
  0x4d   :  { %p771_p7 = scmp.ne.s32.totalorder %s71_s23, %s770_s3  ;;  %p776_p9 = scmp.lt.s32.totalorder %s770_s3, %s770_s3 }
  0x4f   :  { %p777_p10 = por %p776_p9, %p775_p8 }
  0x51   :  { %p778_p11 = pnand %p777_p10, %p771_p7 }
  0x53   :  { %781 = shalt.err (!%p778_p11)
}
  0x54   :  { %76 = dma.hbm_to_vmem [thread:$0]  %s1027_s5, 2048, %s71_s23, [#allocation10], %s839_s28, %s839_s28, %s840_s29  }
  0x55   :  { %826 = dma.done.wait [#allocation4], 128  }
  0x56   :  { %827 = vsyncadd [#allocation4], 4294967168 }
  0x57   :  { %828 = dma.done.wait [#allocation7], 2176  }
  0x58   :  { %829 = vsyncadd [#allocation7], 4294965120 }
  0x59   :  { %830 = dma.done.wait [#allocation10], 4096  }
  0x5a   :  { %831 = vsyncadd [#allocation10], 4294963200  ;;  %v843_v0 = vmov 0.0|0.0   ;;  %vm844_vm0 = vmmov 0   ;;  %v845_v1 = vmov 0.0   ;;  %v132_v2 = vld [vmem:[#allocation9] sm:$0xff] }
  0x5b   :  { %580 = vmatprep.subr.bf16.mxu0 %v843_v0  ;;  %604 = vmatprep.subr.bf16.mxu1 %v843_v0  ;;  %v133_v3 = vld [vmem:[#allocation9 + $0x8] sm:$0xff]  ;;  %v116_v4 = vld [vmem:[#allocation8] sm:$0xff]  ;;  %v134_v7 = vld [vmem:[#allocation9 + $0x10] sm:$0xff] }
  0x5c   :  { %507 = vmatprep.mubr.msk.f32.mxu0 %vm844_vm0, %v845_v1  ;;  %542 = vmatprep.mubr.msk.f32.mxu1 %vm844_vm0, %v845_v1  ;;  %v581_v5 = vpack.c.bf16 %v133_v3, %v132_v2  ;;  %v117_v6 = vld [vmem:[#allocation8 + $0x8] sm:$0xff]  ;;  %v135_v8 = vld [vmem:[#allocation9 + $0x18] sm:$0xff]  ;;  %v118_v10 = vld [vmem:[#allocation8 + $0x10] sm:$0xff] }
  0x5d   :  { %v605_v9 = vpack.c.bf16 %v117_v6, %v116_v4  ;;  %v119_v11 = vld [vmem:[#allocation8 + $0x18] sm:$0xff]  ;;  %v584_v12 = vpack.c.bf16 %v135_v8, %v134_v7  ;;  %v136_v14 = vld [vmem:[#allocation9 + $0x20] sm:$0xff]  ;;  %v137_v15 = vld [vmem:[#allocation9 + $0x28] sm:$0xff] }
  0x5e   :  { %582 = vmatpush3.bf16.msra.mxu0 %v581_v5  ;;  %v608_v13 = vpack.c.bf16 %v119_v11, %v118_v10  ;;  %v120_v16 = vld [vmem:[#allocation8 + $0x20] sm:$0xff]  ;;  %v121_v17 = vld [vmem:[#allocation8 + $0x28] sm:$0xff]  ;;  %v587_v18 = vpack.c.bf16 %v137_v15, %v136_v14  ;;  %v138_v20 = vld [vmem:[#allocation9 + $0x30] sm:$0xff] }
  0x5f   :  { %606 = vmatpush3.bf16.msra.mxu1 %v605_v9  ;;  %583 = vmatprep.subr.bf16.mxu0 %v843_v0  ;;  %v611_v19 = vpack.c.bf16 %v121_v17, %v120_v16  ;;  %v139_v21 = vld [vmem:[#allocation9 + $0x38] sm:$0xff]  ;;  %v122_v22 = vld [vmem:[#allocation8 + $0x30] sm:$0xff]  ;;  %v140_v26 = vld [vmem:[#allocation9 + $0x40] sm:$0xff] }
  0x60   :  { %607 = vmatprep.subr.bf16.mxu1 %v843_v0  ;;  %v123_v23 = vld [vmem:[#allocation8 + $0x38] sm:$0xff]  ;;  %v590_v24 = vpack.c.bf16 %v139_v21, %v138_v20  ;;  %v141_v27 = vld [vmem:[#allocation9 + $0x48] sm:$0xff]  ;;  %v124_v28 = vld [vmem:[#allocation8 + $0x40] sm:$0xff] }
  0x61   :  { %v614_v25 = vpack.c.bf16 %v123_v23, %v122_v22  ;;  %v125_v29 = vld [vmem:[#allocation8 + $0x48] sm:$0xff]  ;;  %v593_v30 = vpack.c.bf16 %v141_v27, %v140_v26  ;;  %v142_v32 = vld [vmem:[#allocation9 + $0x50] sm:$0xff]  ;;  %v143_v33 = vld [vmem:[#allocation9 + $0x58] sm:$0xff] }
  0x62   :  { %585 = vmatpush3.bf16.msra.mxu0 %v584_v12  ;;  %v617_v31 = vpack.c.bf16 %v125_v29, %v124_v28  ;;  %v126_v34 = vld [vmem:[#allocation8 + $0x50] sm:$0xff]  ;;  %v127_v35 = vld [vmem:[#allocation8 + $0x58] sm:$0xff]  ;;  %v596_v36 = vpack.c.bf16 %v143_v33, %v142_v32  ;;  %v144_v38 = vld [vmem:[#allocation9 + $0x60] sm:$0xff] }
  0x63   :  { %609 = vmatpush3.bf16.msra.mxu1 %v608_v13  ;;  %586 = vmatprep.subr.bf16.mxu0 %v843_v0  ;;  %v620_v37 = vpack.c.bf16 %v127_v35, %v126_v34  ;;  %v145_v39 = vld [vmem:[#allocation9 + $0x68] sm:$0xff]  ;;  %v128_v40 = vld [vmem:[#allocation8 + $0x60] sm:$0xff]  ;;  %v146_v44 = vld [vmem:[#allocation9 + $0x70] sm:$0xff] }
  0x64   :  { %610 = vmatprep.subr.bf16.mxu1 %v843_v0  ;;  %v129_v41 = vld [vmem:[#allocation8 + $0x68] sm:$0xff]  ;;  %v599_v42 = vpack.c.bf16 %v145_v39, %v144_v38  ;;  %v147_v45 = vld [vmem:[#allocation9 + $0x78] sm:$0xff]  ;;  %v130_v46 = vld [vmem:[#allocation8 + $0x70] sm:$0xff] }
  0x65   :  { %v623_v43 = vpack.c.bf16 %v129_v41, %v128_v40  ;;  %v131_v47 = vld [vmem:[#allocation8 + $0x78] sm:$0xff]  ;;  %v602_v48 = vpack.c.bf16 %v147_v45, %v146_v44  ;;  %v292_v50 = vld [vmem:[#allocation11] sm:$0xff]  ;;  %v293_v51 = vld [vmem:[#allocation11 + $0x8] sm:$0xff] }
  0x66   :  { %588 = vmatpush3.bf16.msra.mxu0 %v587_v18  ;;  %v626_v49 = vpack.c.bf16 %v131_v47, %v130_v46  ;;  %v115_v52 = vld [vmem:[#allocation6] sm:$0xff]  ;;  %v629_v53 = vpack.c.bf16 %v293_v51, %v292_v50  ;;  %v98_v54 = vld [vmem:[#allocation3] sm:$0xff]  ;;  %v296_v58 = vld [vmem:[#allocation11 + $0x20] sm:$0xff] }
  0x67   :  { %612 = vmatpush3.bf16.msra.mxu1 %v611_v19  ;;  %589 = vmatprep.subr.bf16.mxu0 %v843_v0  ;;  %v294_v55 = vld [vmem:[#allocation11 + $0x10] sm:$0xff]  ;;  %v295_v56 = vld [vmem:[#allocation11 + $0x18] sm:$0xff]  ;;  %v297_v59 = vld [vmem:[#allocation11 + $0x28] sm:$0xff] }
  0x68   :  { %613 = vmatprep.subr.bf16.mxu1 %v843_v0  ;;  %v632_v57 = vpack.c.bf16 %v295_v56, %v294_v55  ;;  %v635_v60 = vpack.c.bf16 %v297_v59, %v296_v58  ;;  %v298_v61 = vld [vmem:[#allocation11 + $0x30] sm:$0xff]  ;;  %v299_v62 = vld [vmem:[#allocation11 + $0x38] sm:$0xff]  ;;  %v300_v2 = vld [vmem:[#allocation11 + $0x40] sm:$0xff] }
  0x69   :  { %v638_v63 = vpack.c.bf16 %v299_v62, %v298_v61  ;;  %v302_v4 = vld [vmem:[#allocation11 + $0x50] sm:$0xff]  ;;  %v303_v5 = vld [vmem:[#allocation11 + $0x58] sm:$0xff]  ;;  %v304_v7 = vld [vmem:[#allocation11 + $0x60] sm:$0xff] }
  0x6a   :  { %591 = vmatpush3.bf16.msra.mxu0 %v590_v24  ;;  %v644_v6 = vpack.c.bf16 %v303_v5, %v302_v4  ;;  %v305_v8 = vld [vmem:[#allocation11 + $0x68] sm:$0xff]  ;;  %v306_v10 = vld [vmem:[#allocation11 + $0x70] sm:$0xff]  ;;  %v307_v11 = vld [vmem:[#allocation11 + $0x78] sm:$0xff] }
  0x6b   :  { %615 = vmatpush3.bf16.msra.mxu1 %v614_v25  ;;  %592 = vmatprep.subr.bf16.mxu0 %v843_v0  ;;  %v647_v9 = vpack.c.bf16 %v305_v8, %v304_v7  ;;  %v650_v12 = vpack.c.bf16 %v307_v11, %v306_v10  ;;  %v422_v14 = vld [vmem:[%s1026_s4] ss:$0 sm:$0xff]  ;;  %s846_s4 = smov [#allocation13]  }
  0x6c   :  { %616 = vmatprep.subr.bf16.mxu1 %v843_v0  ;;  %s407_s21 = sshll.u32 %s846_s4, 4  ;;  %s408_s21 = int_to_ptr.vmem [resolvable:$true] %s407_s21 }
  0x6d   :  { %s782_s22 = scalar_lea.vmem %s408_s21, 128  ;;  %p787_p13 = scmp.lt.s32.totalorder %s408_s21, %s408_s21 }
  0x6e   :  { %594 = vmatpush3.bf16.msra.mxu0 %v593_v30  ;;  %p783_p12 = scmp.ne.s32.totalorder %s408_s21, %s782_s22  ;;  %p788_p0 = scmp.lt.s32.totalorder %s782_s22, %s782_s22 }
  0x6f   :  { %618 = vmatpush3.bf16.msra.mxu1 %v617_v31  ;;  %595 = vmatprep.subr.bf16.mxu0 %v843_v0 }
  0x70   :  { %619 = vmatprep.subr.bf16.mxu1 %v843_v0  ;;  %p789_p1 = por %p788_p0, %p787_p13 }
  0x72   :  { %597 = vmatpush3.bf16.msra.mxu0 %v596_v36  ;;  %p790_p2 = pnand %p789_p1, %p783_p12 }
  0x73   :  { %621 = vmatpush3.bf16.msra.mxu1 %v620_v37  ;;  %598 = vmatprep.subr.bf16.mxu0 %v843_v0 }
  0x74   :  { %622 = vmatprep.subr.bf16.mxu1 %v843_v0 }
  0x76   :  { %600 = vmatpush3.bf16.msra.mxu0 %v599_v42 }
  0x77   :  { %624 = vmatpush3.bf16.msra.mxu1 %v623_v43  ;;  %601 = vmatprep.subr.bf16.mxu0 %v843_v0 }
  0x78   :  { %625 = vmatprep.subr.bf16.mxu1 %v843_v0 }
  0x7a   :  { %603 = vmatpush3.bf16.msra.mxu0 %v602_v48 }
  0x7b   :  { %627 = vmatpush3.bf16.msra.mxu1 %v626_v49  ;;  %628 = vmatprep.subr.bf16.mxu0 %v843_v0 }
  0x7d   :  { %508 = vmatmul.mubr.f32.vlgmr.msra.gmra.mrb[0].mxu0 %v115_v52 }
  0x7e   :  { %543 = vmatmul.mubr.f32.vlgmr.msra.gmra.mrb[0].mxu1 %v98_v54  ;;  %630 = vmatpush3.bf16.msra.mxu0 %v629_v53 }
  0x7f   :  { %631 = vmatprep.subr.bf16.mxu0 %v843_v0  ;;  %577 = vmatprep.mubr.msk.f32.mxu0 %vm844_vm0, %v845_v1  ;;  %v301_v1 = vld [vmem:[#allocation11 + $0x48] sm:$0xff] }
  0x80   :  { %v641_v3 = vpack.c.bf16 %v301_v1, %v300_v2 }
  0x82   :  { %633 = vmatpush3.bf16.msra.mxu0 %v632_v57 }
  0x83   :  { %634 = vmatprep.subr.bf16.mxu0 %v843_v0 }
  0x86   :  { %636 = vmatpush3.bf16.msra.mxu0 %v635_v60 }
  0x87   :  { %637 = vmatprep.subr.bf16.mxu0 %v843_v0 }
  0x8a   :  { %639 = vmatpush3.bf16.msra.mxu0 %v638_v63 }
  0x8b   :  { %640 = vmatprep.subr.bf16.mxu0 %v843_v0 }
  0x8e   :  { %642 = vmatpush3.bf16.msra.mxu0 %v641_v3 }
  0x8f   :  { %643 = vmatprep.subr.bf16.mxu0 %v843_v0 }
  0x92   :  { %645 = vmatpush3.bf16.msra.mxu0 %v644_v6 }
  0x93   :  { %646 = vmatprep.subr.bf16.mxu0 %v843_v0 }
  0x96   :  { %648 = vmatpush3.bf16.msra.mxu0 %v647_v9 }
  0x97   :  { %649 = vmatprep.subr.bf16.mxu0 %v843_v0  ;;  %v423_v0 = vld [vmem:[%s1028_s6] ss:$0 sm:$0xff] }
  0x9a   :  { %651 = vmatpush3.bf16.msra.mxu0 %v650_v12 }
 0x150   :  { %v214_v13 = vpop.f32.mrb[0].mxu0 }
 0x151   :  { %v284_v15 = vpop.f32.mrb[0].mxu1  ;;  %v509_v16 = vpop.f32.mrb[1].mxu0 }
 0x152   :  { %v285_v17 = vadd.f32 %v284_v15, %v214_v13  ;;  %v544_v18 = vpop.f32.mrb[1].mxu1 }
 0x154   :  { %v288_v19 = vadd.f32 %v422_v14, %v285_v17 }
 0x156   :  { %664 = vtanh.f32 %v288_v19 }
 0x160   :  { %v665_v20 = vpop.eup %664 }
 0x161   :  { %v290_v21 = vadd.f32 %v665_v20, %v98_v54 }
 0x163   :  { %666 = vtanh.f32 %v290_v21 }
 0x16d   :  { %v667_v22 = vpop.eup %666 }
 0x16e   :  { %389 = vst [vmem:[#allocation13] sm:$0xff] %v667_v22  ;;  %578 = vmatmul.mubr.f32.vlgmr.msra.gmra.mrb[2].mxu0 %v667_v22 }
 0x241   :  { %v374_v23 = vpop.f32.mrb[2].mxu0 }
 0x242   :  { %v375_v24 = vadd.f32 %v423_v0, %v374_v23  ;;  %v579_v25 = vpop.f32.mrb[3].mxu0 }
 0x244   :  { %378 = vmax.xlane.f32.xlu0 %v375_v24 }
 0x2d1   :  { %v379_v26 = vpop.xlane.xlu0 %378 }
 0x2d2   :  { %v380_v27 = vsub.f32 %v375_v24, %v379_v26 }
 0x2d4   :  { %v381_v28 = vmul.f32 1.442695, %v380_v27 }
 0x2d6   :  { %668 = vpow2.f32 %v381_v28 }
 0x2e0   :  { %v669_v29 = vpop.eup %668 }
 0x2e1   :  { %383 = vadd.xlane.f32.xlu0 %v669_v29 }
 0x2e2   :  { %793 = shalt.err (!%p790_p2)
}
 0x2e3   :  { %s794_s24 = scalar_lea.hbm %s1030_s8, 128 }
 0x2e4   :  { %p795_p3 = scmp.ne.s32.totalorder %s1030_s8, %s794_s24  ;;  %p798_p4 = scmp.lt.u32.totalorder %s794_s24, %s1030_s8 }
 0x2e6   :  { %p800_p5 = pnand %p798_p4, %p795_p3 }
 0x2e8   :  { %803 = shalt.err (!%p800_p5)
}
 0x2e9   :  { %410 = dma.vmem_to_hbm [thread:$0]  %s408_s21, 128, %s1030_s8, [#allocation14]  }
 0x2ea   :  { %s847_s0 = smov [#allocation12]  }
 0x2eb   :  { %s397_s20 = sshll.u32 %s847_s0, 4  ;;  %s398_s20 = int_to_ptr.vmem [resolvable:$true] %s397_s20 }
 0x2ec   :  { %s804_s10 = scalar_lea.vmem %s398_s20, 128  ;;  %p809_p7 = scmp.lt.s32.totalorder %s398_s20, %s398_s20 }
 0x2ed   :  { %p805_p6 = scmp.ne.s32.totalorder %s398_s20, %s804_s10  ;;  %p810_p8 = scmp.lt.s32.totalorder %s804_s10, %s804_s10 }
 0x2ef   :  { %p811_p9 = por %p810_p8, %p809_p7 }
 0x2f1   :  { %p812_p10 = pnand %p811_p9, %p805_p6 }
 0x36e   :  { %v384_v30 = vpop.xlane.xlu0 %383 }
 0x36f   :  { %670 = vlog2.f32 %v384_v30 }
 0x379   :  { %v671_v31 = vpop.eup %670 }
 0x37a   :  { %v386_v32 = vmul.f32 0.6931472, %v671_v31 }
 0x37c   :  { %v387_v33 = vsub.f32 %v380_v27, %v386_v32 }
 0x37e   :  { %388 = vst [vmem:[#allocation12] sm:$0xff] %v387_v33 }
 0x37f   :  { %815 = shalt.err (!%p812_p10)
}
 0x380   :  { %s816_s8 = scalar_lea.hbm %s1029_s7, 128 }
 0x381   :  { %p817_p11 = scmp.ne.s32.totalorder %s1029_s7, %s816_s8  ;;  %p820_p12 = scmp.lt.u32.totalorder %s816_s8, %s1029_s7 }
 0x383   :  { %p822_p13 = pnand %p820_p12, %p817_p11 }
 0x385   :  { %825 = shalt.err (!%p822_p13)
}
 0x386   :  { %400 = dma.vmem_to_hbm [thread:$0]  %s398_s20, 128, %s1029_s7, [#allocation5]  }
 0x387   :  { %832 = dma.done.wait [#allocation5], 128  }
 0x388   :  { %833 = vsyncadd [#allocation5], 4294967168 }
 0x389   :  { %834 = dma.done.wait [#allocation14], 128  }
 0x38a   :  { %835 = vsyncadd [#allocation14], 4294967168 }
 0x38b   :  { %417 = vsyncpa [#allocation4], 1 }
 0x38c   :  { %418 = vsyncpa [#allocation7], 1 }
 0x38d   :  { %419 = vsyncpa [#allocation10], 1 }
 0x38e   :  { %420 = vsyncpa [#allocation5], 1 }
 0x38f   :  { %421 = vsyncpa [#allocation14], 1 }

// kernel: tpu_custom_call.1
= control target key start
LH: loop header
LB: loop body
LE: loop exit
PB: predicated region body
PF: predicated region fallthrough
CT: control target
= control target key end

     0   :  { %14 = vsyncpa [#allocation4], 0  ;;  %s1022_s0 = inlined_call_operand.hbm [shape: f32[8,128], index: 0, kind: input, shape index: {}]   ;;  %s1023_s1 = inlined_call_operand.hbm [shape: f32[1,8,128], index: 1, kind: input, shape index: {}]   ;;  %s1024_s2 = inlined_call_operand.hbm [shape: f32[128,128], index: 2, kind: input, shape index: {}]   ;;  %s1025_s3 = inlined_call_operand.hbm [shape: f32[128,128], index: 3, kind: input, shape index: {}]   ;;  %s1026_s4 = inlined_call_operand.vmem [shape: f32[1,128], index: 4, kind: input, shape index: {}]   ;;  %s1027_s5 = inlined_call_operand.hbm [shape: f32[128,128], index: 5, kind: input, shape index: {}]   ;;  %s1028_s6 = inlined_call_operand.vmem [shape: f32[1,128], index: 6, kind: input, shape index: {}]   ;;  %s1029_s7 = inlined_call_operand.hbm [shape: f32[1,8,128], index: 7, kind: output, shape index: {0}]   ;;  %s1030_s8 = inlined_call_operand.hbm [shape: f32[1,8,128], index: 8, kind: output, shape index: {1}]  }
   0x1   :  { %15 = vsyncpa [#allocation7], 0 }
   0x2   :  { %16 = vsyncpa [#allocation10], 0 }
   0x3   :  { %17 = vsyncpa [#allocation5], 0 }
   0x4   :  { %18 = vsyncpa [#allocation14], 0  ;;  %s836_s27 = smov [#allocation6]   ;;  %s672_s9 = scalar_lea.hbm %s1023_s1, 128 }
   0x5   :  { %s35_s28 = sshll.u32 %s836_s27, 4  ;;  %p673_p0 = scmp.ne.s32.totalorder %s1023_s1, %s672_s9  ;;  %s36_s28 = int_to_ptr.vmem [resolvable:$true] %s35_s28 }
   0x6   :  { %p676_p1 = scmp.lt.u32.totalorder %s672_s9, %s1023_s1 }
   0x8   :  { %p678_p2 = pnand %p676_p1, %p673_p0 }
   0xa   :  { %681 = shalt.err (!%p678_p2)
}
   0xb   :  { %s682_s14 = scalar_lea.vmem %s36_s28, 128  ;;  %p687_p4 = scmp.lt.s32.totalorder %s36_s28, %s36_s28 }
   0xc   :  { %p683_p3 = scmp.ne.s32.totalorder %s36_s28, %s682_s14  ;;  %p688_p5 = scmp.lt.s32.totalorder %s682_s14, %s682_s14 }
   0xe   :  { %p689_p6 = por %p688_p5, %p687_p4 }
  0x10   :  { %p690_p7 = pnand %p689_p6, %p683_p3 }
  0x12   :  { %693 = shalt.err (!%p690_p7)
}
  0x13   :  { %38 = dma.hbm_to_vmem [thread:$0]  %s1023_s1, 128, %s36_s28, [#allocation7]  }
  0x14   :  { %s837_s17 = smov [#allocation9]   ;;  %s838_s19 = smov [#allocation3]  }
  0x15   :  { %s56_s18 = sshll.u32 %s837_s17, 4  ;;  %s25_s20 = sshll.u32 %s838_s19, 4  ;;  %s57_s18 = int_to_ptr.vmem [resolvable:$true] %s56_s18  ;;  %s26_s20 = int_to_ptr.vmem [resolvable:$true] %s25_s20 }
  0x16   :  { %s694_s23 = scalar_lea.hbm %s1025_s3, 2048 }
  0x17   :  { %p695_p8 = scmp.ne.s32.totalorder %s1025_s3, %s694_s23  ;;  %p698_p9 = scmp.lt.u32.totalorder %s694_s23, %s1025_s3 }
  0x19   :  { %p700_p10 = pnand %p698_p9, %p695_p8 }
  0x1b   :  { %703 = shalt.err (!%p700_p10)
}
  0x1c   :  { %s704_s1 = scalar_lea.vmem %s57_s18, 2048  ;;  %p709_p12 = scmp.lt.s32.totalorder %s57_s18, %s57_s18 }
  0x1d   :  { %p705_p11 = scmp.ne.s32.totalorder %s57_s18, %s704_s1  ;;  %p710_p13 = scmp.lt.s32.totalorder %s704_s1, %s704_s1 }
  0x1f   :  { %p711_p0 = por %p710_p13, %p709_p12 }
  0x21   :  { %p712_p1 = pnand %p711_p0, %p705_p11 }
  0x23   :  { %715 = shalt.err (!%p712_p1)
}
  0x24   :  { %s839_s28 = smov 128   ;;  %s840_s29 = smov 8  }
  0x25   :  { %62 = dma.hbm_to_vmem [thread:$0]  %s1025_s3, 2048, %s57_s18, [#allocation10], %s839_s28, %s839_s28, %s840_s29  }
  0x26   :  { %s716_s12 = scalar_lea.hbm %s1022_s0, 128 }
  0x27   :  { %p717_p2 = scmp.ne.s32.totalorder %s1022_s0, %s716_s12  ;;  %p720_p3 = scmp.lt.u32.totalorder %s716_s12, %s1022_s0 }
  0x29   :  { %p722_p4 = pnand %p720_p3, %p717_p2 }
  0x2b   :  { %725 = shalt.err (!%p722_p4)
}
  0x2c   :  { %s726_s17 = scalar_lea.vmem %s26_s20, 128  ;;  %p731_p6 = scmp.lt.s32.totalorder %s26_s20, %s26_s20 }
  0x2d   :  { %p727_p5 = scmp.ne.s32.totalorder %s26_s20, %s726_s17  ;;  %p732_p7 = scmp.lt.s32.totalorder %s726_s17, %s726_s17 }
  0x2f   :  { %p733_p8 = por %p732_p7, %p731_p6 }
  0x31   :  { %p734_p9 = pnand %p733_p8, %p727_p5 }
  0x33   :  { %737 = shalt.err (!%p734_p9)
}
  0x34   :  { %28 = dma.hbm_to_vmem [thread:$0]  %s1022_s0, 128, %s26_s20, [#allocation4]  }
  0x35   :  { %s841_s19 = smov [#allocation8]   ;;  %s842_s22 = smov [#allocation11]  }
  0x36   :  { %s44_s21 = sshll.u32 %s841_s19, 4  ;;  %s70_s23 = sshll.u32 %s842_s22, 4  ;;  %s45_s21 = int_to_ptr.vmem [resolvable:$true] %s44_s21  ;;  %s71_s23 = int_to_ptr.vmem [resolvable:$true] %s70_s23 }
  0x37   :  { %s738_s26 = scalar_lea.hbm %s1024_s2, 2048 }
  0x38   :  { %p739_p10 = scmp.ne.s32.totalorder %s1024_s2, %s738_s26  ;;  %p742_p11 = scmp.lt.u32.totalorder %s738_s26, %s1024_s2 }
  0x3a   :  { %p744_p12 = pnand %p742_p11, %p739_p10 }
  0x3c   :  { %747 = shalt.err (!%p744_p12)
}
  0x3d   :  { %s748_s0 = scalar_lea.vmem %s45_s21, 2048  ;;  %p753_p0 = scmp.lt.s32.totalorder %s45_s21, %s45_s21 }
  0x3e   :  { %p749_p13 = scmp.ne.s32.totalorder %s45_s21, %s748_s0  ;;  %p754_p1 = scmp.lt.s32.totalorder %s748_s0, %s748_s0 }
  0x40   :  { %p755_p2 = por %p754_p1, %p753_p0 }
  0x42   :  { %p756_p3 = pnand %p755_p2, %p749_p13 }
  0x44   :  { %759 = shalt.err (!%p756_p3)
}
  0x45   :  { %50 = dma.hbm_to_vmem [thread:$0]  %s1024_s2, 2048, %s45_s21, [#allocation7], %s839_s28, %s839_s28, %s840_s29  }
  0x46   :  { %s760_s13 = scalar_lea.hbm %s1027_s5, 2048 }
  0x47   :  { %p761_p4 = scmp.ne.s32.totalorder %s1027_s5, %s760_s13  ;;  %p764_p5 = scmp.lt.u32.totalorder %s760_s13, %s1027_s5 }
  0x49   :  { %p766_p6 = pnand %p764_p5, %p761_p4 }
  0x4b   :  { %769 = shalt.err (!%p766_p6)
}
  0x4c   :  { %s770_s3 = scalar_lea.vmem %s71_s23, 2048  ;;  %p775_p8 = scmp.lt.s32.totalorder %s71_s23, %s71_s23 }
  0x4d   :  { %p771_p7 = scmp.ne.s32.totalorder %s71_s23, %s770_s3  ;;  %p776_p9 = scmp.lt.s32.totalorder %s770_s3, %s770_s3 }
  0x4f   :  { %p777_p10 = por %p776_p9, %p775_p8 }
  0x51   :  { %p778_p11 = pnand %p777_p10, %p771_p7 }
  0x53   :  { %781 = shalt.err (!%p778_p11)
}
  0x54   :  { %76 = dma.hbm_to_vmem [thread:$0]  %s1027_s5, 2048, %s71_s23, [#allocation10], %s839_s28, %s839_s28, %s840_s29  }
  0x55   :  { %826 = dma.done.wait [#allocation4], 128  }
  0x56   :  { %827 = vsyncadd [#allocation4], 4294967168 }
  0x57   :  { %828 = dma.done.wait [#allocation7], 2176  }
  0x58   :  { %829 = vsyncadd [#allocation7], 4294965120 }
  0x59   :  { %830 = dma.done.wait [#allocation10], 4096  }
  0x5a   :  { %831 = vsyncadd [#allocation10], 4294963200  ;;  %v843_v0 = vmov 0.0|0.0   ;;  %vm844_vm0 = vmmov 0   ;;  %v845_v1 = vmov 0.0   ;;  %v132_v2 = vld [vmem:[#allocation9] sm:$0xff] }
  0x5b   :  { %580 = vmatprep.subr.bf16.mxu0 %v843_v0  ;;  %604 = vmatprep.subr.bf16.mxu1 %v843_v0  ;;  %v133_v3 = vld [vmem:[#allocation9 + $0x8] sm:$0xff]  ;;  %v116_v4 = vld [vmem:[#allocation8] sm:$0xff]  ;;  %v134_v7 = vld [vmem:[#allocation9 + $0x10] sm:$0xff] }
  0x5c   :  { %507 = vmatprep.mubr.msk.f32.mxu0 %vm844_vm0, %v845_v1  ;;  %542 = vmatprep.mubr.msk.f32.mxu1 %vm844_vm0, %v845_v1  ;;  %v581_v5 = vpack.c.bf16 %v133_v3, %v132_v2  ;;  %v117_v6 = vld [vmem:[#allocation8 + $0x8] sm:$0xff]  ;;  %v135_v8 = vld [vmem:[#allocation9 + $0x18] sm:$0xff]  ;;  %v118_v10 = vld [vmem:[#allocation8 + $0x10] sm:$0xff] }
  0x5d   :  { %v605_v9 = vpack.c.bf16 %v117_v6, %v116_v4  ;;  %v119_v11 = vld [vmem:[#allocation8 + $0x18] sm:$0xff]  ;;  %v584_v12 = vpack.c.bf16 %v135_v8, %v134_v7  ;;  %v136_v14 = vld [vmem:[#allocation9 + $0x20] sm:$0xff]  ;;  %v137_v15 = vld [vmem:[#allocation9 + $0x28] sm:$0xff] }
  0x5e   :  { %582 = vmatpush3.bf16.msra.mxu0 %v581_v5  ;;  %v608_v13 = vpack.c.bf16 %v119_v11, %v118_v10  ;;  %v120_v16 = vld [vmem:[#allocation8 + $0x20] sm:$0xff]  ;;  %v121_v17 = vld [vmem:[#allocation8 + $0x28] sm:$0xff]  ;;  %v587_v18 = vpack.c.bf16 %v137_v15, %v136_v14  ;;  %v138_v20 = vld [vmem:[#allocation9 + $0x30] sm:$0xff] }
  0x5f   :  { %606 = vmatpush3.bf16.msra.mxu1 %v605_v9  ;;  %583 = vmatprep.subr.bf16.mxu0 %v843_v0  ;;  %v611_v19 = vpack.c.bf16 %v121_v17, %v120_v16  ;;  %v139_v21 = vld [vmem:[#allocation9 + $0x38] sm:$0xff]  ;;  %v122_v22 = vld [vmem:[#allocation8 + $0x30] sm:$0xff]  ;;  %v140_v26 = vld [vmem:[#allocation9 + $0x40] sm:$0xff] }
  0x60   :  { %607 = vmatprep.subr.bf16.mxu1 %v843_v0  ;;  %v123_v23 = vld [vmem:[#allocation8 + $0x38] sm:$0xff]  ;;  %v590_v24 = vpack.c.bf16 %v139_v21, %v138_v20  ;;  %v141_v27 = vld [vmem:[#allocation9 + $0x48] sm:$0xff]  ;;  %v124_v28 = vld [vmem:[#allocation8 + $0x40] sm:$0xff] }
  0x61   :  { %v614_v25 = vpack.c.bf16 %v123_v23, %v122_v22  ;;  %v125_v29 = vld [vmem:[#allocation8 + $0x48] sm:$0xff]  ;;  %v593_v30 = vpack.c.bf16 %v141_v27, %v140_v26  ;;  %v142_v32 = vld [vmem:[#allocation9 + $0x50] sm:$0xff]  ;;  %v143_v33 = vld [vmem:[#allocation9 + $0x58] sm:$0xff] }
  0x62   :  { %585 = vmatpush3.bf16.msra.mxu0 %v584_v12  ;;  %v617_v31 = vpack.c.bf16 %v125_v29, %v124_v28  ;;  %v126_v34 = vld [vmem:[#allocation8 + $0x50] sm:$0xff]  ;;  %v127_v35 = vld [vmem:[#allocation8 + $0x58] sm:$0xff]  ;;  %v596_v36 = vpack.c.bf16 %v143_v33, %v142_v32  ;;  %v144_v38 = vld [vmem:[#allocation9 + $0x60] sm:$0xff] }
  0x63   :  { %609 = vmatpush3.bf16.msra.mxu1 %v608_v13  ;;  %586 = vmatprep.subr.bf16.mxu0 %v843_v0  ;;  %v620_v37 = vpack.c.bf16 %v127_v35, %v126_v34  ;;  %v145_v39 = vld [vmem:[#allocation9 + $0x68] sm:$0xff]  ;;  %v128_v40 = vld [vmem:[#allocation8 + $0x60] sm:$0xff]  ;;  %v146_v44 = vld [vmem:[#allocation9 + $0x70] sm:$0xff] }
  0x64   :  { %610 = vmatprep.subr.bf16.mxu1 %v843_v0  ;;  %v129_v41 = vld [vmem:[#allocation8 + $0x68] sm:$0xff]  ;;  %v599_v42 = vpack.c.bf16 %v145_v39, %v144_v38  ;;  %v147_v45 = vld [vmem:[#allocation9 + $0x78] sm:$0xff]  ;;  %v130_v46 = vld [vmem:[#allocation8 + $0x70] sm:$0xff] }
  0x65   :  { %v623_v43 = vpack.c.bf16 %v129_v41, %v128_v40  ;;  %v131_v47 = vld [vmem:[#allocation8 + $0x78] sm:$0xff]  ;;  %v602_v48 = vpack.c.bf16 %v147_v45, %v146_v44  ;;  %v292_v50 = vld [vmem:[#allocation11] sm:$0xff]  ;;  %v293_v51 = vld [vmem:[#allocation11 + $0x8] sm:$0xff] }
  0x66   :  { %588 = vmatpush3.bf16.msra.mxu0 %v587_v18  ;;  %v626_v49 = vpack.c.bf16 %v131_v47, %v130_v46  ;;  %v115_v52 = vld [vmem:[#allocation6] sm:$0xff]  ;;  %v629_v53 = vpack.c.bf16 %v293_v51, %v292_v50  ;;  %v98_v54 = vld [vmem:[#allocation3] sm:$0xff]  ;;  %v296_v58 = vld [vmem:[#allocation11 + $0x20] sm:$0xff] }
  0x67   :  { %612 = vmatpush3.bf16.msra.mxu1 %v611_v19  ;;  %589 = vmatprep.subr.bf16.mxu0 %v843_v0  ;;  %v294_v55 = vld [vmem:[#allocation11 + $0x10] sm:$0xff]  ;;  %v295_v56 = vld [vmem:[#allocation11 + $0x18] sm:$0xff]  ;;  %v297_v59 = vld [vmem:[#allocation11 + $0x28] sm:$0xff] }
  0x68   :  { %613 = vmatprep.subr.bf16.mxu1 %v843_v0  ;;  %v632_v57 = vpack.c.bf16 %v295_v56, %v294_v55  ;;  %v635_v60 = vpack.c.bf16 %v297_v59, %v296_v58  ;;  %v298_v61 = vld [vmem:[#allocation11 + $0x30] sm:$0xff]  ;;  %v299_v62 = vld [vmem:[#allocation11 + $0x38] sm:$0xff]  ;;  %v300_v2 = vld [vmem:[#allocation11 + $0x40] sm:$0xff] }
  0x69   :  { %v638_v63 = vpack.c.bf16 %v299_v62, %v298_v61  ;;  %v302_v4 = vld [vmem:[#allocation11 + $0x50] sm:$0xff]  ;;  %v303_v5 = vld [vmem:[#allocation11 + $0x58] sm:$0xff]  ;;  %v304_v7 = vld [vmem:[#allocation11 + $0x60] sm:$0xff] }
  0x6a   :  { %591 = vmatpush3.bf16.msra.mxu0 %v590_v24  ;;  %v644_v6 = vpack.c.bf16 %v303_v5, %v302_v4  ;;  %v305_v8 = vld [vmem:[#allocation11 + $0x68] sm:$0xff]  ;;  %v306_v10 = vld [vmem:[#allocation11 + $0x70] sm:$0xff]  ;;  %v307_v11 = vld [vmem:[#allocation11 + $0x78] sm:$0xff] }
  0x6b   :  { %615 = vmatpush3.bf16.msra.mxu1 %v614_v25  ;;  %592 = vmatprep.subr.bf16.mxu0 %v843_v0  ;;  %v647_v9 = vpack.c.bf16 %v305_v8, %v304_v7  ;;  %v650_v12 = vpack.c.bf16 %v307_v11, %v306_v10  ;;  %v422_v14 = vld [vmem:[%s1026_s4] ss:$0 sm:$0xff]  ;;  %s846_s4 = smov [#allocation13]  }
  0x6c   :  { %616 = vmatprep.subr.bf16.mxu1 %v843_v0  ;;  %s407_s21 = sshll.u32 %s846_s4, 4  ;;  %s408_s21 = int_to_ptr.vmem [resolvable:$true] %s407_s21 }
  0x6d   :  { %s782_s22 = scalar_lea.vmem %s408_s21, 128  ;;  %p787_p13 = scmp.lt.s32.totalorder %s408_s21, %s408_s21 }
  0x6e   :  { %594 = vmatpush3.bf16.msra.mxu0 %v593_v30  ;;  %p783_p12 = scmp.ne.s32.totalorder %s408_s21, %s782_s22  ;;  %p788_p0 = scmp.lt.s32.totalorder %s782_s22, %s782_s22 }
  0x6f   :  { %618 = vmatpush3.bf16.msra.mxu1 %v617_v31  ;;  %595 = vmatprep.subr.bf16.mxu0 %v843_v0 }
  0x70   :  { %619 = vmatprep.subr.bf16.mxu1 %v843_v0  ;;  %p789_p1 = por %p788_p0, %p787_p13 }
  0x72   :  { %597 = vmatpush3.bf16.msra.mxu0 %v596_v36  ;;  %p790_p2 = pnand %p789_p1, %p783_p12 }
  0x73   :  { %621 = vmatpush3.bf16.msra.mxu1 %v620_v37  ;;  %598 = vmatprep.subr.bf16.mxu0 %v843_v0 }
  0x74   :  { %622 = vmatprep.subr.bf16.mxu1 %v843_v0 }
  0x76   :  { %600 = vmatpush3.bf16.msra.mxu0 %v599_v42 }
  0x77   :  { %624 = vmatpush3.bf16.msra.mxu1 %v623_v43  ;;  %601 = vmatprep.subr.bf16.mxu0 %v843_v0 }
  0x78   :  { %625 = vmatprep.subr.bf16.mxu1 %v843_v0 }
  0x7a   :  { %603 = vmatpush3.bf16.msra.mxu0 %v602_v48 }
  0x7b   :  { %627 = vmatpush3.bf16.msra.mxu1 %v626_v49  ;;  %628 = vmatprep.subr.bf16.mxu0 %v843_v0 }
  0x7d   :  { %508 = vmatmul.mubr.f32.vlgmr.msra.gmra.mrb[0].mxu0 %v115_v52 }
  0x7e   :  { %543 = vmatmul.mubr.f32.vlgmr.msra.gmra.mrb[0].mxu1 %v98_v54  ;;  %630 = vmatpush3.bf16.msra.mxu0 %v629_v53 }
  0x7f   :  { %631 = vmatprep.subr.bf16.mxu0 %v843_v0  ;;  %577 = vmatprep.mubr.msk.f32.mxu0 %vm844_vm0, %v845_v1  ;;  %v301_v1 = vld [vmem:[#allocation11 + $0x48] sm:$0xff] }
  0x80   :  { %v641_v3 = vpack.c.bf16 %v301_v1, %v300_v2 }
  0x82   :  { %633 = vmatpush3.bf16.msra.mxu0 %v632_v57 }
  0x83   :  { %634 = vmatprep.subr.bf16.mxu0 %v843_v0 }
  0x86   :  { %636 = vmatpush3.bf16.msra.mxu0 %v635_v60 }
  0x87   :  { %637 = vmatprep.subr.bf16.mxu0 %v843_v0 }
  0x8a   :  { %639 = vmatpush3.bf16.msra.mxu0 %v638_v63 }
  0x8b   :  { %640 = vmatprep.subr.bf16.mxu0 %v843_v0 }
  0x8e   :  { %642 = vmatpush3.bf16.msra.mxu0 %v641_v3 }
  0x8f   :  { %643 = vmatprep.subr.bf16.mxu0 %v843_v0 }
  0x92   :  { %645 = vmatpush3.bf16.msra.mxu0 %v644_v6 }
  0x93   :  { %646 = vmatprep.subr.bf16.mxu0 %v843_v0 }
  0x96   :  { %648 = vmatpush3.bf16.msra.mxu0 %v647_v9 }
  0x97   :  { %649 = vmatprep.subr.bf16.mxu0 %v843_v0  ;;  %v423_v0 = vld [vmem:[%s1028_s6] ss:$0 sm:$0xff] }
  0x9a   :  { %651 = vmatpush3.bf16.msra.mxu0 %v650_v12 }
 0x150   :  { %v214_v13 = vpop.f32.mrb[0].mxu0 }
 0x151   :  { %v284_v15 = vpop.f32.mrb[0].mxu1  ;;  %v509_v16 = vpop.f32.mrb[1].mxu0 }
 0x152   :  { %v285_v17 = vadd.f32 %v284_v15, %v214_v13  ;;  %v544_v18 = vpop.f32.mrb[1].mxu1 }
 0x154   :  { %v288_v19 = vadd.f32 %v422_v14, %v285_v17 }
 0x156   :  { %664 = vtanh.f32 %v288_v19 }
 0x160   :  { %v665_v20 = vpop.eup %664 }
 0x161   :  { %v290_v21 = vadd.f32 %v665_v20, %v98_v54 }
 0x163   :  { %666 = vtanh.f32 %v290_v21 }
 0x16d   :  { %v667_v22 = vpop.eup %666 }
 0x16e   :  { %389 = vst [vmem:[#allocation13] sm:$0xff] %v667_v22  ;;  %578 = vmatmul.mubr.f32.vlgmr.msra.gmra.mrb[2].mxu0 %v667_v22 }
 0x241   :  { %v374_v23 = vpop.f32.mrb[2].mxu0 }
 0x242   :  { %v375_v24 = vadd.f32 %v423_v0, %v374_v23  ;;  %v579_v25 = vpop.f32.mrb[3].mxu0 }
 0x244   :  { %378 = vmax.xlane.f32.xlu0 %v375_v24 }
 0x2d1   :  { %v379_v26 = vpop.xlane.xlu0 %378 }
 0x2d2   :  { %v380_v27 = vsub.f32 %v375_v24, %v379_v26 }
 0x2d4   :  { %v381_v28 = vmul.f32 1.442695, %v380_v27 }
 0x2d6   :  { %668 = vpow2.f32 %v381_v28 }
 0x2e0   :  { %v669_v29 = vpop.eup %668 }
 0x2e1   :  { %383 = vadd.xlane.f32.xlu0 %v669_v29 }
 0x2e2   :  { %793 = shalt.err (!%p790_p2)
}
 0x2e3   :  { %s794_s24 = scalar_lea.hbm %s1030_s8, 128 }
 0x2e4   :  { %p795_p3 = scmp.ne.s32.totalorder %s1030_s8, %s794_s24  ;;  %p798_p4 = scmp.lt.u32.totalorder %s794_s24, %s1030_s8 }
 0x2e6   :  { %p800_p5 = pnand %p798_p4, %p795_p3 }
 0x2e8   :  { %803 = shalt.err (!%p800_p5)
}
 0x2e9   :  { %410 = dma.vmem_to_hbm [thread:$0]  %s408_s21, 128, %s1030_s8, [#allocation14]  }
 0x2ea   :  { %s847_s0 = smov [#allocation12]  }
 0x2eb   :  { %s397_s20 = sshll.u32 %s847_s0, 4  ;;  %s398_s20 = int_to_ptr.vmem [resolvable:$true] %s397_s20 }
 0x2ec   :  { %s804_s10 = scalar_lea.vmem %s398_s20, 128  ;;  %p809_p7 = scmp.lt.s32.totalorder %s398_s20, %s398_s20 }
 0x2ed   :  { %p805_p6 = scmp.ne.s32.totalorder %s398_s20, %s804_s10  ;;  %p810_p8 = scmp.lt.s32.totalorder %s804_s10, %s804_s10 }
 0x2ef   :  { %p811_p9 = por %p810_p8, %p809_p7 }
 0x2f1   :  { %p812_p10 = pnand %p811_p9, %p805_p6 }
 0x36e   :  { %v384_v30 = vpop.xlane.xlu0 %383 }
 0x36f   :  { %670 = vlog2.f32 %v384_v30 }
 0x379   :  { %v671_v31 = vpop.eup %670 }
 0x37a   :  { %v386_v32 = vmul.f32 0.6931472, %v671_v31 }
 0x37c   :  { %v387_v33 = vsub.f32 %v380_v27, %v386_v32 }
 0x37e   :  { %388 = vst [vmem:[#allocation12] sm:$0xff] %v387_v33 }
 0x37f   :  { %815 = shalt.err (!%p812_p10)
}
 0x380   :  { %s816_s8 = scalar_lea.hbm %s1029_s7, 128 }
 0x381   :  { %p817_p11 = scmp.ne.s32.totalorder %s1029_s7, %s816_s8  ;;  %p820_p12 = scmp.lt.u32.totalorder %s816_s8, %s1029_s7 }
 0x383   :  { %p822_p13 = pnand %p820_p12, %p817_p11 }
 0x385   :  { %825 = shalt.err (!%p822_p13)
}
 0x386   :  { %400 = dma.vmem_to_hbm [thread:$0]  %s398_s20, 128, %s1029_s7, [#allocation5]  }
 0x387   :  { %832 = dma.done.wait [#allocation5], 128  }
 0x388   :  { %833 = vsyncadd [#allocation5], 4294967168 }
 0x389   :  { %834 = dma.done.wait [#allocation14], 128  }
 0x38a   :  { %835 = vsyncadd [#allocation14], 4294967168 }
 0x38b   :  { %417 = vsyncpa [#allocation4], 1 }
 0x38c   :  { %418 = vsyncpa [#allocation7], 1 }
 0x38d   :  { %419 = vsyncpa [#allocation10], 1 }
 0x38e   :  { %420 = vsyncpa [#allocation5], 1 }
 0x38f   :  { %421 = vsyncpa [#allocation14], 1 }

</bundles_post_ra>
